<compile_context>
chip_gen: v5e
topology: v5e:2x2
jax: 0.10.0
libtpu: 0.0.40
codegen_flags: <defaults>
</compile_context>

<pallas_src>
import functools

import jax
import jax.numpy as jnp
from jax.experimental import pallas as pl
from jax.experimental.pallas import tpu as pltpu


def _sobel_kernel(row_ref, col_ref, x_ref, o_ref, *, h, w, epsilon):
    # x_ref/o_ref: (TN, L) float32 with L = h*w; lane k of a row is pixel (k // w, k % w).
    # row_ref/col_ref: (1, L) int32 lane->row / lane->col lookup (precomputed in wrapper).
    l = h * w
    x = x_ref[...]
    row = row_ref[...]
    col = col_ref[...]

    not_left = col != 0            # pixel (i, j-1) exists
    not_right = col != (w - 1)     # pixel (i, j+1) exists
    not_top = row != 0             # pixel (i-1, j) exists
    not_bot = row != (h - 1)       # pixel (i+1, j) exists

    def shifted(a, s, mask):
        # out[n, k] = a[n, k + s] where that neighbour pixel exists, else 0 (zero padding).
        # roll by (-s) mod L puts element k+s at position k; the mask kills wrap-around
        # and out-of-image positions.
        r = pltpu.roll(a, (-s) % l, 1)
        return jnp.where(mask, r, 0.0)

    # --- avg_pool2d(kernel=3, stride=1, padding=1), count_include_pad=True -> always /9.
    #     Separable: 3-tap column sum, then 3-tap row sum, zeros outside the image.
    cs = shifted(x, -1, not_left) + x + shifted(x, +1, not_right)
    pool = (shifted(cs, -w, not_top) + cs + shifted(cs, +w, not_bot)) * (1.0 / 9.0)

    # --- Sobel cross-correlations on the pooled image; conv2d(padding=1) zero-pads `pool`,
    #     which is exactly what the boundary masks implement. Both kernels are separable.
    p_l = shifted(pool, -1, not_left)    # pool[i, j-1]
    p_r = shifted(pool, +1, not_right)   # pool[i, j+1]

    # x-kernel = [1,2,1]^T (rows) (x) [1,0,-1] (cols) / 4
    dx = p_l - p_r
    gx = (shifted(dx, -w, not_top) + 2.0 * dx + shifted(dx, +w, not_bot)) * 0.25

    # y-kernel = [1,0,-1]^T (rows) (x) [1,2,1] (cols) / 4
    sm = p_l + 2.0 * pool + p_r
    gy = (shifted(sm, -w, not_top) - shifted(sm, +w, not_bot)) * 0.25

    o_ref[...] = jnp.sqrt(gx * gx + gy * gy + epsilon)


def _choose_block_n(n, l, bytes_per_elem=4, target_bytes=1 << 20):
    """Largest divisor of n that is sublane-friendly (multiple of 8, or == n) and keeps
    one block at <= ~1 MiB, so step overhead is amortized without stressing VMEM."""
    for tn in range(min(n, 4096), 0, -1):
        if n % tn:
            continue
        if tn != n and tn % 8 != 0:
            continue
        if tn * l * bytes_per_elem <= target_bytes:
            return tn
    return n


def sobel_operator(x, epsilon=1e-4):
    """Pallas equivalent of SobelOperator(epsilon).forward(x). x: (b, c, h, w) float."""
    b, c, h, w = x.shape
    n = b * c
    l = h * w
    xr = x.reshape(n, l).astype(jnp.float32)   # contiguous reshape: no padded HBM copy

    # Tiny lane->(row, col) lookup tables; passed as inputs so the kernel needs no vector
    # integer div/mod and no embedded array constants.
    lane = jnp.arange(l, dtype=jnp.int32)
    row_idx = (lane // w).reshape(1, l)
    col_idx = (lane % w).reshape(1, l)

    tn = _choose_block_n(n, l)

    out = pl.pallas_call(
        functools.partial(_sobel_kernel, h=h, w=w, epsilon=float(epsilon)),
        out_shape=jax.ShapeDtypeStruct((n, l), jnp.float32),
        grid_spec=pltpu.PrefetchScalarGridSpec(
            num_scalar_prefetch=0,
            grid=(n // tn,),
            in_specs=[
                pl.BlockSpec((1, l), lambda i: (0, 0)),   # row_idx (broadcast)
                pl.BlockSpec((1, l), lambda i: (0, 0)),   # col_idx (broadcast)
                pl.BlockSpec((tn, l), lambda i: (i, 0)),  # images, lane-dense
            ],
            out_specs=pl.BlockSpec((tn, l), lambda i: (i, 0)),
        ),
        compiler_params=pltpu.CompilerParams(dimension_semantics=("parallel",)),
    )(row_idx, col_idx, xr)
    return out.reshape(b, c, h, w)


# Fixed Sobel taps exactly as in the PyTorch module (cross-correlation weights), for the
# pure-JAX reference used to validate the kernel.
_KX = ((0.25, 0.0, -0.25),
       (0.50, 0.0, -0.50),
       (0.25, 0.0, -0.25))
_KY = ((0.25, 0.50, 0.25),
       (0.00, 0.00, 0.00),
       (-0.25, -0.50, -0.25))


def _reference(x, epsilon=1e-4):
    """Pure-JAX reference (same math as the PyTorch module, no Pallas)."""
    b, c, h, w = x.shape
    xr = x.reshape(b * c, h, w).astype(jnp.float32)
    xp = jnp.pad(xr, ((0, 0), (1, 1), (1, 1)))
    pool = sum(xp[:, di:di + h, dj:dj + w] for di in range(3) for dj in range(3)) / 9.0
    pp = jnp.pad(pool, ((0, 0), (1, 1), (1, 1)))
    gx = sum(_KX[di][dj] * pp[:, di:di + h, dj:dj + w] for di in range(3) for dj in range(3))
    gy = sum(_KY[di][dj] * pp[:, di:di + h, dj:dj + w] for di in range(3) for dj in range(3))
    return jnp.sqrt(gx * gx + gy * gy + epsilon).reshape(b, c, h, w)


if __name__ == "__main__":
    key = jax.random.PRNGKey(0)
    b, c, h, w = 2, 4, 16, 16
    x = jax.random.normal(key, (b, c, h, w), dtype=jnp.float32)

    eps = 1e-4
    y = jax.block_until_ready(sobel_operator(x, epsilon=eps))

    y_ref = _reference(x, epsilon=eps)
    assert y.shape == (b, c, h, w)
    assert jnp.allclose(y, y_ref, atol=1e-5, rtol=1e-5)
    print("KERNEL_OK")
</pallas_src>

<mosaic_0001>
module attributes {stable_mosaic.version = 11 : i64} {
  func.func @_sobel_kernel(%arg0: i32, %arg1: memref<1x256xi32, #tpu.memory_space<vmem>>, %arg2: memref<1x256xi32, #tpu.memory_space<vmem>>, %arg3: memref<8x256xf32, #tpu.memory_space<vmem>>, %arg4: memref<8x256xf32, #tpu.memory_space<vmem>>) attributes {dimension_semantics = [#tpu.dimension_semantics<parallel>], iteration_bounds = array<i64: 1>, scalar_prefetch = 0 : i64, scratch_operands = 0 : i64, tpu.core_type = #tpu.core_type<tc>, window_params = [{pipeline_mode = #tpu.pipeline_mode<synchronous>, transform_indices = @transform_0, window_bounds = array<i64: 1, 256>}, {pipeline_mode = #tpu.pipeline_mode<synchronous>, transform_indices = @transform_1, window_bounds = array<i64: 1, 256>}, {transform_indices = @transform_2, window_bounds = array<i64: 8, 256>}, {transform_indices = @transform_3, window_bounds = array<i64: 8, 256>}]} {
    %c0 = arith.constant 0 : index
    %c0_0 = arith.constant 0 : index
    %0 = vector.load %arg3[%c0, %c0_0] : memref<8x256xf32, #tpu.memory_space<vmem>>, vector<8x256xf32>
    %c0_1 = arith.constant 0 : index
    %c0_2 = arith.constant 0 : index
    %1 = vector.load %arg1[%c0_1, %c0_2] : memref<1x256xi32, #tpu.memory_space<vmem>>, vector<1x256xi32>
    %c0_3 = arith.constant 0 : index
    %c0_4 = arith.constant 0 : index
    %2 = vector.load %arg2[%c0_3, %c0_4] : memref<1x256xi32, #tpu.memory_space<vmem>>, vector<1x256xi32>
    %c0_i32 = arith.constant 0 : i32
    %3 = vector.broadcast %c0_i32 : i32 to vector<1x256xi32>
    %4 = arith.cmpi ne, %2, %3 : vector<1x256xi32>
    %c15_i32 = arith.constant 15 : i32
    %5 = vector.broadcast %c15_i32 : i32 to vector<1x256xi32>
    %6 = arith.cmpi ne, %2, %5 : vector<1x256xi32>
    %c0_i32_5 = arith.constant 0 : i32
    %7 = vector.broadcast %c0_i32_5 : i32 to vector<1x256xi32>
    %8 = arith.cmpi ne, %1, %7 : vector<1x256xi32>
    %c15_i32_6 = arith.constant 15 : i32
    %9 = vector.broadcast %c15_i32_6 : i32 to vector<1x256xi32>
    %10 = arith.cmpi ne, %1, %9 : vector<1x256xi32>
    %c1_i32 = arith.constant 1 : i32
    %11 = tpu.dynamic_rotate %0 by %c1_i32 dim 1 : vector<8x256xf32>, i32 -> vector<8x256xf32>
    %cst = arith.constant 0.000000e+00 : f32
    %12 = vector.shape_cast %4 : vector<1x256xi1> to vector<1x256xi1>
    %13 = vector.broadcast %12 : vector<1x256xi1> to vector<8x256xi1>
    %14 = vector.broadcast %cst : f32 to vector<8x256xf32>
    %15 = arith.select %13, %11, %14 : vector<8x256xi1>, vector<8x256xf32>
    %16 = arith.addf %15, %0 : vector<8x256xf32>
    %c255_i32 = arith.constant 255 : i32
    %17 = tpu.dynamic_rotate %0 by %c255_i32 dim 1 : vector<8x256xf32>, i32 -> vector<8x256xf32>
    %cst_7 = arith.constant 0.000000e+00 : f32
    %18 = vector.shape_cast %6 : vector<1x256xi1> to vector<1x256xi1>
    %19 = vector.broadcast %18 : vector<1x256xi1> to vector<8x256xi1>
    %20 = vector.broadcast %cst_7 : f32 to vector<8x256xf32>
    %21 = arith.select %19, %17, %20 : vector<8x256xi1>, vector<8x256xf32>
    %22 = arith.addf %16, %21 : vector<8x256xf32>
    %c16_i32 = arith.constant 16 : i32
    %23 = tpu.dynamic_rotate %22 by %c16_i32 dim 1 : vector<8x256xf32>, i32 -> vector<8x256xf32>
    %cst_8 = arith.constant 0.000000e+00 : f32
    %24 = vector.shape_cast %8 : vector<1x256xi1> to vector<1x256xi1>
    %25 = vector.broadcast %24 : vector<1x256xi1> to vector<8x256xi1>
    %26 = vector.broadcast %cst_8 : f32 to vector<8x256xf32>
    %27 = arith.select %25, %23, %26 : vector<8x256xi1>, vector<8x256xf32>
    %28 = arith.addf %27, %22 : vector<8x256xf32>
    %c240_i32 = arith.constant 240 : i32
    %29 = tpu.dynamic_rotate %22 by %c240_i32 dim 1 : vector<8x256xf32>, i32 -> vector<8x256xf32>
    %cst_9 = arith.constant 0.000000e+00 : f32
    %30 = vector.shape_cast %10 : vector<1x256xi1> to vector<1x256xi1>
    %31 = vector.broadcast %30 : vector<1x256xi1> to vector<8x256xi1>
    %32 = vector.broadcast %cst_9 : f32 to vector<8x256xf32>
    %33 = arith.select %31, %29, %32 : vector<8x256xi1>, vector<8x256xf32>
    %34 = arith.addf %28, %33 : vector<8x256xf32>
    %cst_10 = arith.constant 0.111111112 : f32
    %35 = vector.broadcast %cst_10 : f32 to vector<8x256xf32>
    %36 = arith.mulf %34, %35 : vector<8x256xf32>
    %c1_i32_11 = arith.constant 1 : i32
    %37 = tpu.dynamic_rotate %36 by %c1_i32_11 dim 1 : vector<8x256xf32>, i32 -> vector<8x256xf32>
    %cst_12 = arith.constant 0.000000e+00 : f32
    %38 = vector.shape_cast %4 : vector<1x256xi1> to vector<1x256xi1>
    %39 = vector.broadcast %38 : vector<1x256xi1> to vector<8x256xi1>
    %40 = vector.broadcast %cst_12 : f32 to vector<8x256xf32>
    %41 = arith.select %39, %37, %40 : vector<8x256xi1>, vector<8x256xf32>
    %c255_i32_13 = arith.constant 255 : i32
    %42 = tpu.dynamic_rotate %36 by %c255_i32_13 dim 1 : vector<8x256xf32>, i32 -> vector<8x256xf32>
    %cst_14 = arith.constant 0.000000e+00 : f32
    %43 = vector.shape_cast %6 : vector<1x256xi1> to vector<1x256xi1>
    %44 = vector.broadcast %43 : vector<1x256xi1> to vector<8x256xi1>
    %45 = vector.broadcast %cst_14 : f32 to vector<8x256xf32>
    %46 = arith.select %44, %42, %45 : vector<8x256xi1>, vector<8x256xf32>
    %47 = arith.subf %41, %46 : vector<8x256xf32>
    %c16_i32_15 = arith.constant 16 : i32
    %48 = tpu.dynamic_rotate %47 by %c16_i32_15 dim 1 : vector<8x256xf32>, i32 -> vector<8x256xf32>
    %cst_16 = arith.constant 0.000000e+00 : f32
    %49 = vector.shape_cast %8 : vector<1x256xi1> to vector<1x256xi1>
    %50 = vector.broadcast %49 : vector<1x256xi1> to vector<8x256xi1>
    %51 = vector.broadcast %cst_16 : f32 to vector<8x256xf32>
    %52 = arith.select %50, %48, %51 : vector<8x256xi1>, vector<8x256xf32>
    %cst_17 = arith.constant 2.000000e+00 : f32
    %53 = vector.broadcast %cst_17 : f32 to vector<8x256xf32>
    %54 = arith.mulf %53, %47 : vector<8x256xf32>
    %55 = arith.addf %52, %54 : vector<8x256xf32>
    %c240_i32_18 = arith.constant 240 : i32
    %56 = tpu.dynamic_rotate %47 by %c240_i32_18 dim 1 : vector<8x256xf32>, i32 -> vector<8x256xf32>
    %cst_19 = arith.constant 0.000000e+00 : f32
    %57 = vector.shape_cast %10 : vector<1x256xi1> to vector<1x256xi1>
    %58 = vector.broadcast %57 : vector<1x256xi1> to vector<8x256xi1>
    %59 = vector.broadcast %cst_19 : f32 to vector<8x256xf32>
    %60 = arith.select %58, %56, %59 : vector<8x256xi1>, vector<8x256xf32>
    %61 = arith.addf %55, %60 : vector<8x256xf32>
    %cst_20 = arith.constant 2.500000e-01 : f32
    %62 = vector.broadcast %cst_20 : f32 to vector<8x256xf32>
    %63 = arith.mulf %61, %62 : vector<8x256xf32>
    %cst_21 = arith.constant 2.000000e+00 : f32
    %64 = vector.broadcast %cst_21 : f32 to vector<8x256xf32>
    %65 = arith.mulf %64, %36 : vector<8x256xf32>
    %66 = arith.addf %41, %65 : vector<8x256xf32>
    %67 = arith.addf %66, %46 : vector<8x256xf32>
    %c16_i32_22 = arith.constant 16 : i32
    %68 = tpu.dynamic_rotate %67 by %c16_i32_22 dim 1 : vector<8x256xf32>, i32 -> vector<8x256xf32>
    %cst_23 = arith.constant 0.000000e+00 : f32
    %69 = vector.shape_cast %8 : vector<1x256xi1> to vector<1x256xi1>
    %70 = vector.broadcast %69 : vector<1x256xi1> to vector<8x256xi1>
    %71 = vector.broadcast %cst_23 : f32 to vector<8x256xf32>
    %72 = arith.select %70, %68, %71 : vector<8x256xi1>, vector<8x256xf32>
    %c240_i32_24 = arith.constant 240 : i32
    %73 = tpu.dynamic_rotate %67 by %c240_i32_24 dim 1 : vector<8x256xf32>, i32 -> vector<8x256xf32>
    %cst_25 = arith.constant 0.000000e+00 : f32
    %74 = vector.shape_cast %10 : vector<1x256xi1> to vector<1x256xi1>
    %75 = vector.broadcast %74 : vector<1x256xi1> to vector<8x256xi1>
    %76 = vector.broadcast %cst_25 : f32 to vector<8x256xf32>
    %77 = arith.select %75, %73, %76 : vector<8x256xi1>, vector<8x256xf32>
    %78 = arith.subf %72, %77 : vector<8x256xf32>
    %cst_26 = arith.constant 2.500000e-01 : f32
    %79 = vector.broadcast %cst_26 : f32 to vector<8x256xf32>
    %80 = arith.mulf %78, %79 : vector<8x256xf32>
    %81 = arith.mulf %63, %63 : vector<8x256xf32>
    %82 = arith.mulf %80, %80 : vector<8x256xf32>
    %83 = arith.addf %81, %82 : vector<8x256xf32>
    %cst_27 = arith.constant 9.99999974E-5 : f32
    %84 = vector.broadcast %cst_27 : f32 to vector<8x256xf32>
    %85 = arith.addf %83, %84 : vector<8x256xf32>
    %86 = math.sqrt %85 : vector<8x256xf32>
    %c0_28 = arith.constant 0 : index
    %c0_29 = arith.constant 0 : index
    %87 = vector.load %arg4[%c0_28, %c0_29] : memref<8x256xf32, #tpu.memory_space<vmem>>, vector<8x256xf32>
    tpu.vector_store %arg4[%c0_28, %c0_29], %86 {strides = array<i32>} : memref<8x256xf32, #tpu.memory_space<vmem>>, vector<8x256xf32>,
    return
  }
  func.func @transform_0(%arg0: i32) -> (i32, i32) {
    %c0_i32 = arith.constant 0 : i32
    %c0_i32_0 = arith.constant 0 : i32
    %c0_i32_1 = arith.constant 0 : i32
    return %c0_i32, %c0_i32_0 : i32, i32
  }
  func.func @transform_1(%arg0: i32) -> (i32, i32) {
    %c0_i32 = arith.constant 0 : i32
    %c0_i32_0 = arith.constant 0 : i32
    %c0_i32_1 = arith.constant 0 : i32
    return %c0_i32, %c0_i32_0 : i32, i32
  }
  func.func @transform_2(%arg0: i32) -> (i32, i32) {
    %c0_i32 = arith.constant 0 : i32
    %c0_i32_0 = arith.constant 0 : i32
    return %arg0, %c0_i32 : i32, i32
  }
  func.func @transform_3(%arg0: i32) -> (i32, i32) {
    %c0_i32 = arith.constant 0 : i32
    %c0_i32_0 = arith.constant 0 : i32
    return %arg0, %c0_i32 : i32, i32
  }
}

</mosaic_0001>

<bundles_post_ra>
// kernel: tpu_custom_call.1
= control target key start
LH: loop header
LB: loop body
LE: loop exit
PB: predicated region body
PF: predicated region fallthrough
CT: control target
= control target key end

     0   :  { %8 = vsyncpa [#allocation3], 0  ;;  %s546_s0 = inlined_call_operand.hbm [shape: s32[1,256], index: 0, kind: input, shape index: {}]   ;;  %s547_s1 = inlined_call_operand.hbm [shape: s32[1,256], index: 1, kind: input, shape index: {}]   ;;  %s548_s2 = inlined_call_operand.hbm [shape: f32[8,256], index: 2, kind: input, shape index: {}]   ;;  %s549_s3 = inlined_call_operand.hbm [shape: f32[8,256], index: 3, kind: output, shape index: {}]  }
   0x1   :  { %9 = vsyncpa [#allocation6], 0  ;;  %s27_s14 = sshll.u32 %s547_s1, 4  ;;  %s28_s14 = int_to_ptr.hbm [resolvable:$true] %s27_s14 }
   0x2   :  { %10 = vsyncpa [#allocation4], 0  ;;  %s367_s15 = smov [#allocation5]   ;;  %s16_s19 = sshll.u32 %s546_s0, 4  ;;  %s17_s19 = int_to_ptr.hbm [resolvable:$true] %s16_s19 }
   0x3   :  { %s29_s16 = sshll.u32 %s367_s15, 4  ;;  %s368_s20 = smov [#allocation2]   ;;  %s30_s16 = int_to_ptr.vmem [resolvable:$true] %s29_s16 }
   0x4   :  { %32 = dma.hbm_to_vmem [thread:$0]  %s28_s14, 32, %s30_s16, [#allocation6]  }
   0x5   :  { %s18_s21 = sshll.u32 %s368_s20, 4  ;;  %s38_s24 = sshll.u32 %s548_s2, 4  ;;  %s19_s21 = int_to_ptr.vmem [resolvable:$true] %s18_s21  ;;  %s39_s24 = int_to_ptr.hbm [resolvable:$true] %s38_s24 }
   0x6   :  { %21 = dma.hbm_to_vmem [thread:$0]  %s17_s19, 32, %s19_s21, [#allocation3]  }
   0x7   :  { %s369_s1 = smov [#allocation7]  }
   0x8   :  { %s40_s25 = sshll.u32 %s369_s1, 4  ;;  %s41_s25 = int_to_ptr.vmem [resolvable:$true] %s40_s25 }
   0x9   :  { %43 = dma.hbm_to_vmem [thread:$0]  %s39_s24, 256, %s41_s25, [#allocation6]  }
   0xa   :  { %361 = dma.done.wait [#allocation3], 32  }
   0xb   :  { %362 = vsyncadd [#allocation3], 4294967264 }
   0xc   :  { %363 = dma.done.wait [#allocation6], 288  }
   0xd   :  { %364 = vsyncadd [#allocation6], 4294967008  ;;  %v56_v0 = vld [vmem:[#allocation7] sm:$0xff]  ;;  %s370_s0 = smov 127   ;;  %s371_s26 = smov 1   ;;  %v57_v1 = vld [vmem:[#allocation7 + $0x8] sm:$0xff]  ;;  %v68_v3 = vlaneseq }
   0xe   :  { %82 = vrot.lane.b32.xlu1 %v56_v0, %s370_s0  ;;  %64 = vrot.lane.b32.xlu0 %v56_v0, %s371_s26  ;;  %v59_v2 = vld [vmem:[#allocation5] sm:$0x3]  ;;  %v372_v6 = vmov 0   ;;  %s373_s2 = smov 112   ;;  %s374_s27 = smov 16  }
   0xf   :  { %vm60_vm0 = vcmp.ne.s32.totalorder %v59_v2, 0  ;;  %vm61_vm1 = vcmp.ne.s32.totalorder %v59_v2, 15  ;;  %v409_v9 = vand.u32 127, %v68_v3  ;;  %v58_v32 = vld [vmem:[#allocation2] sm:$0x3]  ;;  %s375_s28 = smov [#allocation8]  }
  0x10   :  { %v73_v7 = vsel %vm60_vm0, 1, %v372_v6  ;;  %v89_v8 = vsel %vm61_vm1, 1, %v372_v6  ;;  %vm62_vm8 = vcmp.ne.s32.totalorder %v58_v32, 0  ;;  %vm63_vm9 = vcmp.ne.s32.totalorder %v58_v32, 15  ;;  %s239_s29 = sshll.u32 %s375_s28, 4  ;;  %s241_s5 = sshll.u32 %s549_s3, 4  ;;  %s240_s29 = int_to_ptr.vmem [resolvable:$true] %s239_s29  ;;  %s242_s5 = int_to_ptr.hbm [resolvable:$true] %s241_s5 }
  0x11   :  { %v74_v10 = vperm.slane %v73_v7, 0  ;;  %v75_v11 = vperm.slane %v73_v7, 1  ;;  %v90_v12 = vperm.slane %v89_v8, 0  ;;  %v91_v13 = vperm.slane %v89_v8, 1 }
  0x12   :  { %vm86_vm2 = vcmp.lt.s32.totalorder %v409_v9, 127  ;;  %vm70_vm3 = vcmp.lt.s32.totalorder %v409_v9, 1  ;;  %v105_v34 = vsel %vm62_vm8, 1, %v372_v6  ;;  %vm102_vm10 = vcmp.lt.s32.totalorder %v409_v9, 16 }
  0x13   :  { %vm413_vm4 = vcmp.eq.s32.totalorder %v74_v10, 1  ;;  %vm417_vm5 = vcmp.eq.s32.totalorder %v75_v11, 1  ;;  %vm421_vm6 = vcmp.eq.s32.totalorder %v90_v12, 1  ;;  %vm425_vm7 = vcmp.eq.s32.totalorder %v91_v13, 1 }
  0x14   :  { %v106_v35 = vperm.slane %v105_v34, 0  ;;  %v107_v36 = vperm.slane %v105_v34, 1  ;;  %v121_v38 = vsel %vm63_vm9, 1, %v372_v6  ;;  %vm118_vm13 = vcmp.lt.s32.totalorder %v409_v9, 112 }
  0x15   :  { %v122_v43 = vperm.slane %v121_v38, 0  ;;  %v123_v44 = vperm.slane %v121_v38, 1 }
  0x16   :  { %84 = vrot.lane.b32.xlu1 %v57_v1, %s370_s0  ;;  %66 = vrot.lane.b32.xlu0 %v57_v1, %s371_s26  ;;  %vm450_vm11 = vcmp.eq.s32.totalorder %v106_v35, 1  ;;  %vm454_vm12 = vcmp.eq.s32.totalorder %v107_v36, 1 }
  0x17   :  { %vm467_vm14 = vcmp.eq.s32.totalorder %v122_v43, 1  ;;  %vm471_vm15 = vcmp.eq.s32.totalorder %v123_v44, 1 }
  0x80   :  { %v83_v4 = vpop.permute.xlu1 %82  ;;  %v65_v5 = vpop.permute.xlu0 %64 }
  0x88   :  { %v85_v18 = vpop.permute.xlu1 %84  ;;  %v67_v19 = vpop.permute.xlu0 %66 }
  0x89   :  { %v87_v20 = vsel %vm86_vm2, %v83_v4, %v85_v18  ;;  %v88_v21 = vsel %vm86_vm2, %v85_v18, %v83_v4  ;;  %v71_v22 = vsel %vm70_vm3, %v65_v5, %v67_v19  ;;  %v72_v23 = vsel %vm70_vm3, %v67_v19, %v65_v5 }
  0x8a   :  { %v78_v24 = vsel %vm413_vm4, %v72_v23, 0.0  ;;  %v79_v25 = vsel %vm417_vm5, %v71_v22, 0.0  ;;  %v94_v28 = vsel %vm421_vm6, %v87_v20, 0.0  ;;  %v95_v29 = vsel %vm425_vm7, %v88_v21, 0.0 }
  0x8b   :  { %v80_v26 = vadd.f32 %v78_v24, %v56_v0  ;;  %v81_v27 = vadd.f32 %v79_v25, %v57_v1 }
  0x8d   :  { %v96_v30 = vadd.f32 %v94_v28, %v80_v26  ;;  %v97_v31 = vadd.f32 %v95_v29, %v81_v27 }
  0x8f   :  { %114 = vrot.lane.b32.xlu0 %v96_v30, %s373_s2  ;;  %98 = vrot.lane.b32.xlu2 %v96_v30, %s374_s27 }
  0x90   :  { %116 = vrot.lane.b32.xlu1 %v97_v31, %s373_s2 }
  0x97   :  { %100 = vrot.lane.b32.xlu2 %v97_v31, %s374_s27 }
  0xe9   :  { %v99_v33 = vpop.permute.xlu2 %98 }
  0xf1   :  { %v101_v37 = vpop.permute.xlu2 %100 }
  0xf2   :  { %v103_v41 = vsel %vm102_vm10, %v99_v33, %v101_v37  ;;  %v104_v42 = vsel %vm102_vm10, %v101_v37, %v99_v33 }
  0xf3   :  { %v110_v45 = vsel %vm450_vm11, %v104_v42, 0.0  ;;  %v111_v46 = vsel %vm454_vm12, %v103_v41, 0.0 }
  0xf4   :  { %v112_v51 = vadd.f32 %v110_v45, %v96_v30  ;;  %v113_v52 = vadd.f32 %v111_v46, %v97_v31 }
 0x101   :  { %v115_v47 = vpop.permute.xlu0 %114 }
 0x102   :  { %v117_v50 = vpop.permute.xlu1 %116 }
 0x103   :  { %v119_v53 = vsel %vm118_vm13, %v115_v47, %v117_v50  ;;  %v120_v54 = vsel %vm118_vm13, %v117_v50, %v115_v47 }
 0x104   :  { %v126_v55 = vsel %vm467_vm14, %v119_v53, 0.0  ;;  %v127_v56 = vsel %vm471_vm15, %v120_v54, 0.0 }
 0x105   :  { %v128_v57 = vadd.f32 %v126_v55, %v112_v51  ;;  %v129_v58 = vadd.f32 %v127_v56, %v113_v52 }
 0x107   :  { %v130_v59 = vmul.f32 0.11111111, %v128_v57  ;;  %v131_v60 = vmul.f32 0.11111111, %v129_v58 }
 0x109   :  { %140 = vrot.lane.b32.xlu1 %v130_v59, %s370_s0  ;;  %132 = vrot.lane.b32.xlu2 %v130_v59, %s371_s26  ;;  %v175_v12 = vmul.f32 2.0, %v131_v60  ;;  %v174_v13 = vmul.f32 2.0, %v130_v59 }
 0x10a   :  { %134 = vrot.lane.b32.xlu0 %v131_v60, %s371_s26 }
 0x111   :  { %142 = vrot.lane.b32.xlu2 %v131_v60, %s370_s0 }
 0x163   :  { %v133_v61 = vpop.permute.xlu2 %132 }
 0x16b   :  { %v143_v62 = vpop.permute.xlu2 %142 }
 0x17b   :  { %v141_v63 = vpop.permute.xlu1 %140 }
 0x17c   :  { %v144_v0 = vsel %vm86_vm2, %v141_v63, %v143_v62  ;;  %v145_v1 = vsel %vm86_vm2, %v143_v62, %v141_v63  ;;  %v135_v2 = vpop.permute.xlu0 %134 }
 0x17d   :  { %v146_v3 = vsel %vm421_vm6, %v144_v0, 0.0  ;;  %v147_v4 = vsel %vm425_vm7, %v145_v1, 0.0  ;;  %v136_v5 = vsel %vm70_vm3, %v133_v61, %v135_v2  ;;  %v137_v6 = vsel %vm70_vm3, %v135_v2, %v133_v61 }
 0x17e   :  { %v138_v7 = vsel %vm413_vm4, %v137_v6, 0.0  ;;  %v139_v8 = vsel %vm417_vm5, %v136_v5, 0.0 }
 0x17f   :  { %v148_v10 = vsub.f32 %v138_v7, %v146_v3  ;;  %v149_v11 = vsub.f32 %v139_v8, %v147_v4  ;;  %v177_v16 = vadd.f32 %v175_v12, %v139_v8  ;;  %v176_v17 = vadd.f32 %v174_v13, %v138_v7 }
 0x181   :  { %162 = vrot.lane.b32.xlu2 %v148_v10, %s373_s2  ;;  %150 = vrot.lane.b32.xlu0 %v148_v10, %s374_s27  ;;  %v179_v18 = vadd.f32 %v177_v16, %v147_v4  ;;  %v178_v19 = vadd.f32 %v176_v17, %v146_v3  ;;  %v158_v29 = vmul.f32 2.0, %v148_v10  ;;  %v159_v30 = vmul.f32 2.0, %v149_v11 }
 0x182   :  { %152 = vrot.lane.b32.xlu1 %v149_v11, %s374_s27 }
 0x189   :  { %164 = vrot.lane.b32.xlu0 %v149_v11, %s373_s2  ;;  %182 = vrot.lane.b32.xlu2 %v179_v18, %s374_s27 }
 0x18a   :  { %180 = vrot.lane.b32.xlu1 %v178_v19, %s374_s27 }
 0x191   :  { %188 = vrot.lane.b32.xlu0 %v178_v19, %s373_s2 }
 0x192   :  { %190 = vrot.lane.b32.xlu1 %v179_v18, %s373_s2 }
 0x1db   :  { %v163_v20 = vpop.permute.xlu2 %162 }
 0x1e3   :  { %v183_v35 = vpop.permute.xlu2 %182 }
 0x1f3   :  { %v151_v14 = vpop.permute.xlu0 %150 }
 0x1f4   :  { %v153_v15 = vpop.permute.xlu1 %152 }
 0x1f5   :  { %v154_v21 = vsel %vm102_vm10, %v151_v14, %v153_v15  ;;  %v155_v22 = vsel %vm102_vm10, %v153_v15, %v151_v14 }
 0x1f6   :  { %v156_v27 = vsel %vm450_vm11, %v155_v22, 0.0  ;;  %v157_v28 = vsel %vm454_vm12, %v154_v21, 0.0 }
 0x1f7   :  { %v160_v33 = vadd.f32 %v158_v29, %v156_v27  ;;  %v161_v34 = vadd.f32 %v159_v30, %v157_v28 }
 0x1fb   :  { %v165_v23 = vpop.permute.xlu0 %164 }
 0x1fc   :  { %v181_v24 = vpop.permute.xlu1 %180  ;;  %v166_v25 = vsel %vm118_vm13, %v163_v20, %v165_v23  ;;  %v167_v26 = vsel %vm118_vm13, %v165_v23, %v163_v20 }
 0x1fd   :  { %v168_v31 = vsel %vm467_vm14, %v166_v25, 0.0  ;;  %v169_v32 = vsel %vm471_vm15, %v167_v26, 0.0  ;;  %v184_v38 = vsel %vm102_vm10, %v181_v24, %v183_v35  ;;  %v185_v41 = vsel %vm102_vm10, %v183_v35, %v181_v24 }
 0x1fe   :  { %v170_v36 = vadd.f32 %v168_v31, %v160_v33  ;;  %v171_v37 = vadd.f32 %v169_v32, %v161_v34  ;;  %v186_v46 = vsel %vm450_vm11, %v185_v41, 0.0  ;;  %v187_v47 = vsel %vm454_vm12, %v184_v38, 0.0 }
 0x200   :  { %v172_v52 = vmul.f32 0.25, %v170_v36  ;;  %v173_v53 = vmul.f32 0.25, %v171_v37 }
 0x202   :  { %v200_v9 = vmul.f32 %v172_v52, %v172_v52  ;;  %v201_v58 = vmul.f32 %v173_v53, %v173_v53 }
 0x203   :  { %v189_v42 = vpop.permute.xlu0 %188 }
 0x204   :  { %v191_v43 = vpop.permute.xlu1 %190 }
 0x205   :  { %v192_v44 = vsel %vm118_vm13, %v189_v42, %v191_v43  ;;  %v193_v45 = vsel %vm118_vm13, %v191_v43, %v189_v42 }
 0x206   :  { %v194_v50 = vsel %vm467_vm14, %v192_v44, 0.0  ;;  %v195_v51 = vsel %vm471_vm15, %v193_v45, 0.0 }
 0x207   :  { %v196_v54 = vsub.f32 %v186_v46, %v194_v50  ;;  %v197_v55 = vsub.f32 %v187_v47, %v195_v51 }
 0x209   :  { %v198_v56 = vmul.f32 0.25, %v196_v54  ;;  %v199_v57 = vmul.f32 0.25, %v197_v55 }
 0x20b   :  { %v202_v59 = vmul.f32 %v198_v56, %v198_v56  ;;  %v203_v39 = vmul.f32 %v199_v57, %v199_v57 }
 0x20d   :  { %v204_v60 = vadd.f32 %v202_v59, %v200_v9  ;;  %v205_v61 = vadd.f32 %v203_v39, %v201_v58 }
 0x20f   :  { %v206_v40 = vadd.f32 0.0001, %v204_v60  ;;  %v207_v62 = vadd.f32 0.0001, %v205_v61 }
 0x211   :  { %261 = vrsqrt.f32 %v206_v40  ;;  %vm215_vm0 = vcmp.eq.f32.partialorder %v206_v40, inf  ;;  %v218_v11 = vand.u32 2147483648, %v206_v40  ;;  %vm217_vm1 = vcmp.eq.f32.partialorder %v206_v40, 0.0 }
 0x212   :  { %263 = vrsqrt.f32 %v207_v62  ;;  %vm227_vm2 = vcmp.eq.f32.partialorder %v207_v62, inf  ;;  %v230_v16 = vand.u32 2147483648, %v207_v62  ;;  %vm229_vm3 = vcmp.eq.f32.partialorder %v207_v62, 0.0 }
 0x217   :  { %v262_v48 = vpop.eup %261 }
 0x218   :  { %v264_v63 = vpop.eup %263  ;;  %v209_v49 = vmul.f32 %v262_v48, %v206_v40 }
 0x219   :  { %v221_v0 = vmul.f32 %v264_v63, %v207_v62 }
 0x21a   :  { %v210_v1 = vmul.f32 %v262_v48, %v209_v49 }
 0x21b   :  { %v222_v2 = vmul.f32 %v264_v63, %v221_v0 }
 0x21c   :  { %v211_v3 = vmul.f32 0.5, %v210_v1 }
 0x21d   :  { %v223_v4 = vmul.f32 0.5, %v222_v2 }
 0x21e   :  { %v212_v5 = vsub.f32 1.5, %v211_v3 }
 0x21f   :  { %v224_v6 = vsub.f32 1.5, %v223_v4 }
 0x220   :  { %v213_v7 = vmul.f32 %v262_v48, %v212_v5 }
 0x221   :  { %v225_v8 = vmul.f32 %v264_v63, %v224_v6 }
 0x222   :  { %v214_v10 = vmul.f32 %v213_v7, %v206_v40 }
 0x223   :  { %v226_v12 = vmul.f32 %v225_v8, %v207_v62 }
 0x224   :  { %v216_v13 = vsel %vm215_vm0, %v206_v40, %v214_v10 }
 0x225   :  { %v219_v17 = vsel %vm217_vm1, %v218_v11, %v216_v13  ;;  %v228_v18 = vsel %vm227_vm2, %v207_v62, %v226_v12 }
 0x226   :  { %v231_v19 = vsel %vm229_vm3, %v230_v16, %v228_v18  ;;  %232 = vst [vmem:[#allocation8] sm:$0xff] %v219_v17 }
 0x227   :  { %233 = vst [vmem:[#allocation8 + $0x8] sm:$0xff] %v231_v19 }
 0x228   :  { %244 = dma.vmem_to_hbm [thread:$0]  %s240_s29, 256, %s242_s5, [#allocation4]  }
 0x229   :  { %365 = dma.done.wait [#allocation4], 256  }
 0x22a   :  { %366 = vsyncadd [#allocation4], 4294967040 }
 0x22b   :  { %249 = vsyncpa [#allocation3], 1 }
 0x22c   :  { %250 = vsyncpa [#allocation6], 1 }
 0x22d   :  { %251 = vsyncpa [#allocation4], 1 }

</bundles_post_ra>
